<compile_context>
chip_gen: v6e
topology: v6e:2x2x1
jax: 0.10.0
libtpu: 0.0.40
codegen_flags: <defaults>
</compile_context>

<pallas_src>
import functools

import jax
import jax.numpy as jnp
from jax.experimental import pallas as pl
from jax.experimental.pallas import tpu as pltpu

LEAKY_SLOPE = 0.01        # PyTorch nn.LeakyReLU default negative_slope
H1_PAD = 640              # 516 padded up to the next multiple of 128
HEAD_HIDDEN = 512         # fused policy(256) || value(256) hidden width
MAX_BATCH_TILE = 256      # M tile when batch is large (MXU-friendly on v6e/v7x)


def _lrelu(x):
    # maximum(x, a*x) == LeakyReLU for 0 < a < 1; one vmul+vmax per vreg.
    return jnp.maximum(x, LEAKY_SLOPE * x)


def _linear_bf16(h_f32, w_ref, b_ref):
    # bf16 MXU matmul with f32 accumulation; bias add / activations stay f32.
    return (
        jnp.dot(
            h_f32.astype(jnp.bfloat16),
            w_ref[...],
            preferred_element_type=jnp.float32,
        )
        + b_ref[...]
    )


def a2c_kernel(
    x_ref,
    w1_ref, b1_ref,
    w2_ref, b2_ref,
    w3_ref, b3_ref,
    wh1_ref, bh1_ref,
    wh2_ref, bh2_ref,
    out_ref,
):
    # base: Linear(in,640pad) -> LeakyReLU -> Linear(640,256) -> LeakyReLU
    #       -> Linear(256,256) -> LeakyReLU
    h = _lrelu(_linear_bf16(x_ref[...], w1_ref, b1_ref))   # [m, 640]
    h = _lrelu(_linear_bf16(h, w2_ref, b2_ref))            # [m, 256]
    h = _lrelu(_linear_bf16(h, w3_ref, b3_ref))            # [m, 256]

    # fused heads: [m,256] @ [256,512] -> LeakyReLU -> [m,512] @ [512,128]
    # (block-diagonal second weight => logits in cols [:n_actions],
    #  value in col n_actions, rest zero-padding)
    hh = _lrelu(_linear_bf16(h, wh1_ref, bh1_ref))         # [m, 512]
    out_ref[...] = _linear_bf16(hh, wh2_ref, bh2_ref).astype(out_ref.dtype)


@functools.partial(jax.jit, static_argnames=("n_actions",))
def a2c_forward(x, packed, *, n_actions):
    """x: [batch, in_features] f32; packed: dict from pack_params()."""
    batch, in_features = x.shape
    out_pad = packed["wh2"].shape[1]

    if batch <= MAX_BATCH_TILE:
        tile_m = batch
        padded_batch = batch
    else:
        tile_m = MAX_BATCH_TILE
        padded_batch = pl.cdiv(batch, tile_m) * tile_m
        if padded_batch != batch:
            x = jnp.pad(x, ((0, padded_batch - batch), (0, 0)))

    weight_args = (
        packed["w1"], packed["b1"],
        packed["w2"], packed["b2"],
        packed["w3"], packed["b3"],
        packed["wh1"], packed["bh1"],
        packed["wh2"], packed["bh2"],
    )

    grid = (padded_batch // tile_m,)
    # Activations are tiled over batch; weights/biases use a constant
    # index_map so they stay VMEM-resident across grid steps.
    in_specs = [pl.BlockSpec((tile_m, in_features), lambda i: (i, 0))]
    in_specs += [pl.BlockSpec(a.shape, lambda i: (0, 0)) for a in weight_args]

    out = pl.pallas_call(
        a2c_kernel,
        out_shape=jax.ShapeDtypeStruct((padded_batch, out_pad), jnp.float32),
        grid=grid,
        in_specs=in_specs,
        out_specs=pl.BlockSpec((tile_m, out_pad), lambda i: (i, 0)),
        compiler_params=pltpu.CompilerParams(
            dimension_semantics=("parallel",),
        ),
    )(x, *weight_args)

    logits = out[:batch, :n_actions]
    value = out[:batch, n_actions:n_actions + 1]
    return logits, value


def init_params(key, input_shape, n_actions):
    """Deterministic init mirroring PyTorch Linear default U(-1/sqrt(fan_in), +).
    Weights stored transposed [in, out]; biases [1, out]."""
    layer_dims = {
        "1": (input_shape, 516),
        "2": (516, 256),
        "3": (256, 256),
        "p1": (256, 256),
        "p2": (256, n_actions),
        "v1": (256, 256),
        "v2": (256, 1),
    }
    params = {}
    for name, (fan_in, fan_out) in layer_dims.items():
        key, kw, kb = jax.random.split(key, 3)
        bound = 1.0 / jnp.sqrt(jnp.float32(fan_in))
        params[f"w{name}"] = jax.random.uniform(
            kw, (fan_in, fan_out), jnp.float32, -bound, bound
        )
        params[f"b{name}"] = jax.random.uniform(
            kb, (1, fan_out), jnp.float32, -bound, bound
        )
    return params


def pack_params(params, n_actions):
    """Pad 516->640, fuse the two heads, cast weights to bf16 (biases stay f32)."""
    out_pad = ((n_actions + 1 + 127) // 128) * 128

    w1 = jnp.pad(params["w1"], ((0, 0), (0, H1_PAD - params["w1"].shape[1])))
    b1 = jnp.pad(params["b1"], ((0, 0), (0, H1_PAD - params["b1"].shape[1])))
    w2 = jnp.pad(params["w2"], ((0, H1_PAD - params["w2"].shape[0]), (0, 0)))

    # fused first head layer: [256, 512] = wp1 || wv1
    wh1 = jnp.concatenate([params["wp1"], params["wv1"]], axis=1)
    bh1 = jnp.concatenate([params["bp1"], params["bv1"]], axis=1)

    # fused, lane-dense second head layer: block-diagonal [512, out_pad]
    wh2 = jnp.zeros((HEAD_HIDDEN, out_pad), jnp.float32)
    wh2 = wh2.at[:256, :n_actions].set(params["wp2"])
    wh2 = wh2.at[256:, n_actions].set(params["wv2"][:, 0])
    bh2 = jnp.zeros((1, out_pad), jnp.float32)
    bh2 = bh2.at[:, :n_actions].set(params["bp2"][0])
    bh2 = bh2.at[:, n_actions].set(params["bv2"][0, 0])

    def w(a):
        return a.astype(jnp.bfloat16)

    return {
        "w1": w(w1), "b1": b1,
        "w2": w(w2), "b2": params["b2"],
        "w3": w(params["w3"]), "b3": params["b3"],
        "wh1": w(wh1), "bh1": bh1,
        "wh2": w(wh2), "bh2": bh2,
    }


def reference_forward(x, params):
    """Plain-JAX reference mirroring the kernel's bf16-weight / f32-accumulate math."""
    def lin(h, wname, bname):
        return (
            jnp.dot(
                h.astype(jnp.bfloat16),
                params[wname].astype(jnp.bfloat16),
                preferred_element_type=jnp.float32,
            )
            + params[bname]
        )

    def lrelu(h):
        return jnp.maximum(h, LEAKY_SLOPE * h)

    h = lrelu(lin(x, "w1", "b1"))
    h = lrelu(lin(h, "w2", "b2"))
    h = lrelu(lin(h, "w3", "b3"))
    logits = lin(lrelu(lin(h, "wp1", "bp1")), "wp2", "bp2")
    value = lin(lrelu(lin(h, "wv1", "bv1")), "wv2", "bv2")
    return logits, value


if __name__ == "__main__":
    key = jax.random.PRNGKey(0)
    key, kx = jax.random.split(key)

    batch = 2
    input_shape = 32
    n_actions = 8

    params = init_params(key, input_shape, n_actions)
    packed = pack_params(params, n_actions)
    x = jax.random.normal(kx, (batch, input_shape), jnp.float32)

    logits, value = a2c_forward(x, packed, n_actions=n_actions)
    jax.block_until_ready((logits, value))

    ref_logits, ref_value = reference_forward(x, params)
    assert logits.shape == (batch, n_actions)
    assert value.shape == (batch, 1)
    assert jnp.allclose(logits, ref_logits, atol=2e-2, rtol=2e-2), (
        float(jnp.max(jnp.abs(logits - ref_logits)))
    )
    assert jnp.allclose(value, ref_value, atol=2e-2, rtol=2e-2), (
        float(jnp.max(jnp.abs(value - ref_value)))
    )

    print("KERNEL_OK")
</pallas_src>

<mosaic_0001>
module attributes {stable_mosaic.version = 11 : i64} {
  func.func @a2c_kernel(%arg0: i32, %arg1: memref<2x32xf32, #tpu.memory_space<vmem>>, %arg2: memref<32x640xbf16, #tpu.memory_space<vmem>>, %arg3: memref<1x640xf32, #tpu.memory_space<vmem>>, %arg4: memref<640x256xbf16, #tpu.memory_space<vmem>>, %arg5: memref<1x256xf32, #tpu.memory_space<vmem>>, %arg6: memref<256x256xbf16, #tpu.memory_space<vmem>>, %arg7: memref<1x256xf32, #tpu.memory_space<vmem>>, %arg8: memref<256x512xbf16, #tpu.memory_space<vmem>>, %arg9: memref<1x512xf32, #tpu.memory_space<vmem>>, %arg10: memref<512x128xbf16, #tpu.memory_space<vmem>>, %arg11: memref<1x128xf32, #tpu.memory_space<vmem>>, %arg12: memref<2x128xf32, #tpu.memory_space<vmem>>) attributes {dimension_semantics = [#tpu.dimension_semantics<parallel>], iteration_bounds = array<i64: 1>, scalar_prefetch = 0 : i64, scratch_operands = 0 : i64, tpu.core_type = #tpu.core_type<tc>, window_params = [{transform_indices = @transform_0, window_bounds = array<i64: 2, 32>}, {pipeline_mode = #tpu.pipeline_mode<synchronous>, transform_indices = @transform_1, window_bounds = array<i64: 32, 640>}, {pipeline_mode = #tpu.pipeline_mode<synchronous>, transform_indices = @transform_2, window_bounds = array<i64: 1, 640>}, {pipeline_mode = #tpu.pipeline_mode<synchronous>, transform_indices = @transform_3, window_bounds = array<i64: 640, 256>}, {pipeline_mode = #tpu.pipeline_mode<synchronous>, transform_indices = @transform_4, window_bounds = array<i64: 1, 256>}, {pipeline_mode = #tpu.pipeline_mode<synchronous>, transform_indices = @transform_5, window_bounds = array<i64: 256, 256>}, {pipeline_mode = #tpu.pipeline_mode<synchronous>, transform_indices = @transform_6, window_bounds = array<i64: 1, 256>}, {pipeline_mode = #tpu.pipeline_mode<synchronous>, transform_indices = @transform_7, window_bounds = array<i64: 256, 512>}, {pipeline_mode = #tpu.pipeline_mode<synchronous>, transform_indices = @transform_8, window_bounds = array<i64: 1, 512>}, {pipeline_mode = #tpu.pipeline_mode<synchronous>, transform_indices = @transform_9, window_bounds = array<i64: 512, 128>}, {pipeline_mode = #tpu.pipeline_mode<synchronous>, transform_indices = @transform_10, window_bounds = array<i64: 1, 128>}, {transform_indices = @transform_11, window_bounds = array<i64: 2, 128>}]} {
    %c0 = arith.constant 0 : index
    %c0_0 = arith.constant 0 : index
    %0 = vector.load %arg1[%c0, %c0_0] : memref<2x32xf32, #tpu.memory_space<vmem>>, vector<2x32xf32>
    %1 = arith.truncf %0 : vector<2x32xf32> to vector<2x32xbf16>
    %c0_1 = arith.constant 0 : index
    %c0_2 = arith.constant 0 : index
    %2 = vector.load %arg2[%c0_1, %c0_2] : memref<32x640xbf16, #tpu.memory_space<vmem>>, vector<32x640xbf16>
    %cst = arith.constant dense<0.000000e+00> : vector<2x640xf32>
    %3 = tpu.matmul %1, %2, %cst {dimension_numbers = #tpu.dot_dimension_numbers<[1], [0], [0], [1], [0, 0, 1, 1], [], []>} : vector<2x32xbf16>, vector<32x640xbf16>, vector<2x640xf32> -> vector<2x640xf32>
    %c0_3 = arith.constant 0 : index
    %c0_4 = arith.constant 0 : index
    %4 = vector.load %arg3[%c0_3, %c0_4] : memref<1x640xf32, #tpu.memory_space<vmem>>, vector<1x640xf32>
    %5 = vector.broadcast %4 : vector<1x640xf32> to vector<2x640xf32>
    %6 = arith.addf %3, %5 : vector<2x640xf32>
    %cst_5 = arith.constant 0.00999999977 : f32
    %7 = vector.broadcast %cst_5 : f32 to vector<2x640xf32>
    %8 = arith.mulf %7, %6 : vector<2x640xf32>
    %9 = arith.maximumf %6, %8 : vector<2x640xf32>
    %10 = arith.truncf %9 : vector<2x640xf32> to vector<2x640xbf16>
    %c0_6 = arith.constant 0 : index
    %c0_7 = arith.constant 0 : index
    %11 = vector.load %arg4[%c0_6, %c0_7] : memref<640x256xbf16, #tpu.memory_space<vmem>>, vector<640x256xbf16>
    %cst_8 = arith.constant dense<0.000000e+00> : vector<2x256xf32>
    %12 = tpu.matmul %10, %11, %cst_8 {dimension_numbers = #tpu.dot_dimension_numbers<[1], [0], [0], [1], [0, 0, 1, 1], [], []>} : vector<2x640xbf16>, vector<640x256xbf16>, vector<2x256xf32> -> vector<2x256xf32>
    %c0_9 = arith.constant 0 : index
    %c0_10 = arith.constant 0 : index
    %13 = vector.load %arg5[%c0_9, %c0_10] : memref<1x256xf32, #tpu.memory_space<vmem>>, vector<1x256xf32>
    %14 = vector.broadcast %13 : vector<1x256xf32> to vector<2x256xf32>
    %15 = arith.addf %12, %14 : vector<2x256xf32>
    %cst_11 = arith.constant 0.00999999977 : f32
    %16 = vector.broadcast %cst_11 : f32 to vector<2x256xf32>
    %17 = arith.mulf %16, %15 : vector<2x256xf32>
    %18 = arith.maximumf %15, %17 : vector<2x256xf32>
    %19 = arith.truncf %18 : vector<2x256xf32> to vector<2x256xbf16>
    %c0_12 = arith.constant 0 : index
    %c0_13 = arith.constant 0 : index
    %20 = vector.load %arg6[%c0_12, %c0_13] : memref<256x256xbf16, #tpu.memory_space<vmem>>, vector<256x256xbf16>
    %cst_14 = arith.constant dense<0.000000e+00> : vector<2x256xf32>
    %21 = tpu.matmul %19, %20, %cst_14 {dimension_numbers = #tpu.dot_dimension_numbers<[1], [0], [0], [1], [0, 0, 1, 1], [], []>} : vector<2x256xbf16>, vector<256x256xbf16>, vector<2x256xf32> -> vector<2x256xf32>
    %c0_15 = arith.constant 0 : index
    %c0_16 = arith.constant 0 : index
    %22 = vector.load %arg7[%c0_15, %c0_16] : memref<1x256xf32, #tpu.memory_space<vmem>>, vector<1x256xf32>
    %23 = vector.broadcast %22 : vector<1x256xf32> to vector<2x256xf32>
    %24 = arith.addf %21, %23 : vector<2x256xf32>
    %cst_17 = arith.constant 0.00999999977 : f32
    %25 = vector.broadcast %cst_17 : f32 to vector<2x256xf32>
    %26 = arith.mulf %25, %24 : vector<2x256xf32>
    %27 = arith.maximumf %24, %26 : vector<2x256xf32>
    %28 = arith.truncf %27 : vector<2x256xf32> to vector<2x256xbf16>
    %c0_18 = arith.constant 0 : index
    %c0_19 = arith.constant 0 : index
    %29 = vector.load %arg8[%c0_18, %c0_19] : memref<256x512xbf16, #tpu.memory_space<vmem>>, vector<256x512xbf16>
    %cst_20 = arith.constant dense<0.000000e+00> : vector<2x512xf32>
    %30 = tpu.matmul %28, %29, %cst_20 {dimension_numbers = #tpu.dot_dimension_numbers<[1], [0], [0], [1], [0, 0, 1, 1], [], []>} : vector<2x256xbf16>, vector<256x512xbf16>, vector<2x512xf32> -> vector<2x512xf32>
    %c0_21 = arith.constant 0 : index
    %c0_22 = arith.constant 0 : index
    %31 = vector.load %arg9[%c0_21, %c0_22] : memref<1x512xf32, #tpu.memory_space<vmem>>, vector<1x512xf32>
    %32 = vector.broadcast %31 : vector<1x512xf32> to vector<2x512xf32>
    %33 = arith.addf %30, %32 : vector<2x512xf32>
    %cst_23 = arith.constant 0.00999999977 : f32
    %34 = vector.broadcast %cst_23 : f32 to vector<2x512xf32>
    %35 = arith.mulf %34, %33 : vector<2x512xf32>
    %36 = arith.maximumf %33, %35 : vector<2x512xf32>
    %37 = arith.truncf %36 : vector<2x512xf32> to vector<2x512xbf16>
    %c0_24 = arith.constant 0 : index
    %c0_25 = arith.constant 0 : index
    %38 = vector.load %arg10[%c0_24, %c0_25] : memref<512x128xbf16, #tpu.memory_space<vmem>>, vector<512x128xbf16>
    %cst_26 = arith.constant dense<0.000000e+00> : vector<2x128xf32>
    %39 = tpu.matmul %37, %38, %cst_26 {dimension_numbers = #tpu.dot_dimension_numbers<[1], [0], [0], [1], [0, 0, 1, 1], [], []>} : vector<2x512xbf16>, vector<512x128xbf16>, vector<2x128xf32> -> vector<2x128xf32>
    %c0_27 = arith.constant 0 : index
    %c0_28 = arith.constant 0 : index
    %40 = vector.load %arg11[%c0_27, %c0_28] : memref<1x128xf32, #tpu.memory_space<vmem>>, vector<1x128xf32>
    %41 = vector.broadcast %40 : vector<1x128xf32> to vector<2x128xf32>
    %42 = arith.addf %39, %41 : vector<2x128xf32>
    %c0_29 = arith.constant 0 : index
    %c0_30 = arith.constant 0 : index
    %43 = vector.load %arg12[%c0_29, %c0_30] : memref<2x128xf32, #tpu.memory_space<vmem>>, vector<2x128xf32>
    tpu.vector_store %arg12[%c0_29, %c0_30], %42 {strides = array<i32>} : memref<2x128xf32, #tpu.memory_space<vmem>>, vector<2x128xf32>,
    return
  }
  func.func @transform_0(%arg0: i32) -> (i32, i32) {
    %c0_i32 = arith.constant 0 : i32
    %c0_i32_0 = arith.constant 0 : i32
    return %arg0, %c0_i32 : i32, i32
  }
  func.func @transform_1(%arg0: i32) -> (i32, i32) {
    %c0_i32 = arith.constant 0 : i32
    %c0_i32_0 = arith.constant 0 : i32
    %c0_i32_1 = arith.constant 0 : i32
    return %c0_i32, %c0_i32_0 : i32, i32
  }
  func.func @transform_2(%arg0: i32) -> (i32, i32) {
    %c0_i32 = arith.constant 0 : i32
    %c0_i32_0 = arith.constant 0 : i32
    %c0_i32_1 = arith.constant 0 : i32
    return %c0_i32, %c0_i32_0 : i32, i32
  }
  func.func @transform_3(%arg0: i32) -> (i32, i32) {
    %c0_i32 = arith.constant 0 : i32
    %c0_i32_0 = arith.constant 0 : i32
    %c0_i32_1 = arith.constant 0 : i32
    return %c0_i32, %c0_i32_0 : i32, i32
  }
  func.func @transform_4(%arg0: i32) -> (i32, i32) {
    %c0_i32 = arith.constant 0 : i32
    %c0_i32_0 = arith.constant 0 : i32
    %c0_i32_1 = arith.constant 0 : i32
    return %c0_i32, %c0_i32_0 : i32, i32
  }
  func.func @transform_5(%arg0: i32) -> (i32, i32) {
    %c0_i32 = arith.constant 0 : i32
    %c0_i32_0 = arith.constant 0 : i32
    %c0_i32_1 = arith.constant 0 : i32
    return %c0_i32, %c0_i32_0 : i32, i32
  }
  func.func @transform_6(%arg0: i32) -> (i32, i32) {
    %c0_i32 = arith.constant 0 : i32
    %c0_i32_0 = arith.constant 0 : i32
    %c0_i32_1 = arith.constant 0 : i32
    return %c0_i32, %c0_i32_0 : i32, i32
  }
  func.func @transform_7(%arg0: i32) -> (i32, i32) {
    %c0_i32 = arith.constant 0 : i32
    %c0_i32_0 = arith.constant 0 : i32
    %c0_i32_1 = arith.constant 0 : i32
    return %c0_i32, %c0_i32_0 : i32, i32
  }
  func.func @transform_8(%arg0: i32) -> (i32, i32) {
    %c0_i32 = arith.constant 0 : i32
    %c0_i32_0 = arith.constant 0 : i32
    %c0_i32_1 = arith.constant 0 : i32
    return %c0_i32, %c0_i32_0 : i32, i32
  }
  func.func @transform_9(%arg0: i32) -> (i32, i32) {
    %c0_i32 = arith.constant 0 : i32
    %c0_i32_0 = arith.constant 0 : i32
    %c0_i32_1 = arith.constant 0 : i32
    return %c0_i32, %c0_i32_0 : i32, i32
  }
  func.func @transform_10(%arg0: i32) -> (i32, i32) {
    %c0_i32 = arith.constant 0 : i32
    %c0_i32_0 = arith.constant 0 : i32
    %c0_i32_1 = arith.constant 0 : i32
    return %c0_i32, %c0_i32_0 : i32, i32
  }
  func.func @transform_11(%arg0: i32) -> (i32, i32) {
    %c0_i32 = arith.constant 0 : i32
    %c0_i32_0 = arith.constant 0 : i32
    return %arg0, %c0_i32 : i32, i32
  }
}

</mosaic_0001>

<bundles_post_ra>
// kernel: a2c_forward.1
= control target key start
LH: loop header
LB: loop body
LE: loop exit
PB: predicated region body
PF: predicated region fallthrough
CT: control target
= control target key end

     0   :  { %16 = vsyncpa [#allocation3], 0  ;;  %s3038_s0 = inlined_call_operand.hbm [shape: f32[2,32], index: 0, kind: input, shape index: {}]   ;;  %s3039_s1 = inlined_call_operand.hbm [shape: bf16[32,640], index: 1, kind: input, shape index: {}]   ;;  %s3040_s2 = inlined_call_operand.hbm [shape: f32[1,640], index: 2, kind: input, shape index: {}]   ;;  %s3041_s3 = inlined_call_operand.hbm [shape: bf16[640,256], index: 3, kind: input, shape index: {}]   ;;  %s3042_s4 = inlined_call_operand.vmem [shape: f32[1,256], index: 4, kind: input, shape index: {}]   ;;  %s3043_s5 = inlined_call_operand.hbm [shape: bf16[256,256], index: 5, kind: input, shape index: {}]   ;;  %s3044_s6 = inlined_call_operand.hbm [shape: f32[1,256], index: 6, kind: input, shape index: {}]   ;;  %s3045_s7 = inlined_call_operand.hbm [shape: bf16[256,512], index: 7, kind: input, shape index: {}]   ;;  %s3046_s8 = inlined_call_operand.vmem [shape: f32[1,512], index: 8, kind: input, shape index: {}]   ;;  %s3047_s9 = inlined_call_operand.hbm [shape: bf16[512,128], index: 9, kind: input, shape index: {}]   ;;  %s3048_s10 = inlined_call_operand.vmem [shape: f32[1,128], index: 10, kind: input, shape index: {}]   ;;  %s3049_s11 = inlined_call_operand.vmem [shape: f32[2,128], index: 11, kind: output, shape index: {}]  }
   0x1   :  { %17 = vsyncpa [#allocation5], 0 }
   0x2   :  { %18 = vsyncpa [#allocation8], 0 }
   0x3   :  { %19 = vsyncpa [#allocation11], 0 }
   0x4   :  { %20 = vsyncpa [#allocation14], 0  ;;  %s2877_s17 = smov [#allocation4]  }
   0x5   :  { %s36_s18 = sshll.u32 %s2877_s17, 4  ;;  %s37_s18 = int_to_ptr.vmem [resolvable:$true] %s36_s18 }
   0x6   :  { %s2715_s19 = scalar_lea.vmem %s37_s18, 1280  ;;  %p2720_p1 = scmp.lt.s32.totalorder %s37_s18, %s37_s18 }
   0x7   :  { %p2716_p0 = scmp.ne.s32.totalorder %s37_s18, %s2715_s19  ;;  %p2721_p2 = scmp.lt.s32.totalorder %s2715_s19, %s2715_s19 }
   0x9   :  { %p2722_p3 = por %p2721_p2, %p2720_p1 }
   0xb   :  { %p2723_p4 = pnand %p2722_p3, %p2716_p0 }
   0xd   :  { %2726 = shalt.err (!%p2723_p4)
}
   0xe   :  { %s2878_s20 = smov 320   ;;  %s2879_s21 = smov 20  }
   0xf   :  { %42 = dma.hbm_to_vmem [thread:$0]  %s3039_s1, 1280, %s37_s18, [#allocation5], %s2878_s20, %s2878_s20, %s2879_s21  }
  0x10   :  { %s2880_s24 = smov [#allocation7]  }
  0x11   :  { %s58_s25 = sshll.u32 %s2880_s24, 4  ;;  %s59_s25 = int_to_ptr.vmem [resolvable:$true] %s58_s25 }
  0x12   :  { %s2735_s26 = scalar_lea.vmem %s59_s25, 10240  ;;  %p2740_p6 = scmp.lt.s32.totalorder %s59_s25, %s59_s25 }
  0x13   :  { %p2736_p5 = scmp.ne.s32.totalorder %s59_s25, %s2735_s26  ;;  %p2741_p7 = scmp.lt.s32.totalorder %s2735_s26, %s2735_s26 }
  0x15   :  { %p2742_p8 = por %p2741_p7, %p2740_p6 }
  0x17   :  { %p2743_p9 = pnand %p2742_p8, %p2736_p5 }
  0x19   :  { %2746 = shalt.err (!%p2743_p9)
}
  0x1a   :  { %s2881_s27 = smov 128   ;;  %s2882_s28 = smov 8  }
  0x1b   :  { %64 = dma.hbm_to_vmem [thread:$0]  %s3041_s3, 10240, %s59_s25, [#allocation8], %s2881_s27, %s2881_s27, %s2882_s28  }
  0x1c   :  { %s2883_s1 = smov [#allocation10]   ;;  %s2884_s13 = smov [#allocation2]  }
  0x1d   :  { %s85_s12 = sshll.u32 %s2883_s1, 4  ;;  %s27_s14 = sshll.u32 %s2884_s13, 4  ;;  %s86_s12 = int_to_ptr.vmem [resolvable:$true] %s85_s12  ;;  %s28_s14 = int_to_ptr.vmem [resolvable:$true] %s27_s14 }
  0x1e   :  { %s2755_s15 = scalar_lea.vmem %s86_s12, 32  ;;  %p2760_p11 = scmp.lt.s32.totalorder %s86_s12, %s86_s12 }
  0x1f   :  { %p2756_p10 = scmp.ne.s32.totalorder %s86_s12, %s2755_s15  ;;  %p2761_p12 = scmp.lt.s32.totalorder %s2755_s15, %s2755_s15 }
  0x21   :  { %p2762_p13 = por %p2761_p12, %p2760_p11 }
  0x23   :  { %p2763_p0 = pnand %p2762_p13, %p2756_p10 }
  0x25   :  { %2766 = shalt.err (!%p2763_p0)
}
  0x26   :  { %88 = dma.hbm_to_vmem [thread:$0]  %s3044_s6, 32, %s86_s12, [#allocation11]  }
  0x27   :  { %s2775_s18 = scalar_lea.vmem %s28_s14, 32  ;;  %p2780_p2 = scmp.lt.s32.totalorder %s28_s14, %s28_s14 }
  0x28   :  { %p2776_p1 = scmp.ne.s32.totalorder %s28_s14, %s2775_s18  ;;  %p2781_p3 = scmp.lt.s32.totalorder %s2775_s18, %s2775_s18 }
  0x2a   :  { %p2782_p4 = por %p2781_p3, %p2780_p2 }
  0x2c   :  { %p2783_p5 = pnand %p2782_p4, %p2776_p1 }
  0x2e   :  { %2786 = shalt.err (!%p2783_p5)
}
  0x2f   :  { %30 = dma.hbm_to_vmem [thread:$0]  %s3038_s0, 32, %s28_s14, [#allocation3]  }
  0x30   :  { %s2885_s20 = smov [#allocation6]   ;;  %s2886_s22 = smov [#allocation9]  }
  0x31   :  { %s49_s21 = sshll.u32 %s2885_s20, 4  ;;  %s72_s23 = sshll.u32 %s2886_s22, 4  ;;  %s50_s21 = int_to_ptr.vmem [resolvable:$true] %s49_s21  ;;  %s73_s23 = int_to_ptr.vmem [resolvable:$true] %s72_s23 }
  0x32   :  { %s2795_s24 = scalar_lea.vmem %s50_s21, 80  ;;  %s2799_s6 = scalar_lea.vmem %s50_s21, 96 }
  0x33   :  { %p2796_p6 = scmp.ne.s32.totalorder %s50_s21, %s2795_s24  ;;  %p2800_p7 = scmp.lt.s32.totalorder %s50_s21, %s50_s21 }
  0x34   :  { %p2801_p8 = scmp.lt.s32.totalorder %s2799_s6, %s2795_s24 }
  0x36   :  { %p2802_p9 = por %p2801_p8, %p2800_p7 }
  0x38   :  { %p2803_p10 = pnand %p2802_p9, %p2796_p6 }
  0x3a   :  { %2806 = shalt.err (!%p2803_p10)
}
  0x3b   :  { %52 = dma.hbm_to_vmem [thread:$0]  %s3040_s2, 80, %s50_s21, [#allocation5]  }
  0x3c   :  { %s2815_s29 = scalar_lea.vmem %s73_s23, 4096  ;;  %p2820_p12 = scmp.lt.s32.totalorder %s73_s23, %s73_s23 }
  0x3d   :  { %p2816_p11 = scmp.ne.s32.totalorder %s73_s23, %s2815_s29  ;;  %p2821_p13 = scmp.lt.s32.totalorder %s2815_s29, %s2815_s29 }
  0x3f   :  { %p2822_p0 = por %p2821_p13, %p2820_p12 }
  0x41   :  { %p2823_p1 = pnand %p2822_p0, %p2816_p11 }
  0x43   :  { %2826 = shalt.err (!%p2823_p1)
}
  0x44   :  { %78 = dma.hbm_to_vmem [thread:$0]  %s3043_s5, 4096, %s73_s23, [#allocation8], %s2881_s27, %s2881_s27, %s2882_s28  }
  0x45   :  { %s2887_s1 = smov [#allocation12]  }
  0x46   :  { %s94_s12 = sshll.u32 %s2887_s1, 4  ;;  %s95_s12 = int_to_ptr.vmem [resolvable:$true] %s94_s12 }
  0x47   :  { %s2835_s13 = scalar_lea.vmem %s95_s12, 8192  ;;  %p2840_p3 = scmp.lt.s32.totalorder %s95_s12, %s95_s12 }
  0x48   :  { %p2836_p2 = scmp.ne.s32.totalorder %s95_s12, %s2835_s13  ;;  %p2841_p4 = scmp.lt.s32.totalorder %s2835_s13, %s2835_s13 }
  0x4a   :  { %p2842_p5 = por %p2841_p4, %p2840_p3 }
  0x4c   :  { %p2843_p6 = pnand %p2842_p5, %p2836_p2 }
  0x4e   :  { %2846 = shalt.err (!%p2843_p6)
}
  0x4f   :  { %s2888_s2 = smov 256   ;;  %s2889_s14 = smov 16  }
  0x50   :  { %100 = dma.hbm_to_vmem [thread:$0]  %s3045_s7, 8192, %s95_s12, [#allocation11], %s2888_s2, %s2888_s2, %s2889_s14  }
  0x51   :  { %s2890_s17 = smov [#allocation13]  }
  0x52   :  { %s108_s18 = sshll.u32 %s2890_s17, 4  ;;  %s109_s18 = int_to_ptr.vmem [resolvable:$true] %s108_s18 }
  0x53   :  { %s2855_s5 = scalar_lea.vmem %s109_s18, 4096  ;;  %p2860_p8 = scmp.lt.s32.totalorder %s109_s18, %s109_s18 }
  0x54   :  { %p2856_p7 = scmp.ne.s32.totalorder %s109_s18, %s2855_s5  ;;  %p2861_p9 = scmp.lt.s32.totalorder %s2855_s5, %s2855_s5 }
  0x56   :  { %p2862_p10 = por %p2861_p9, %p2860_p8 }
  0x58   :  { %p2863_p11 = pnand %p2862_p10, %p2856_p7 }
  0x5a   :  { %2866 = shalt.err (!%p2863_p11)
}
  0x5b   :  { %s2891_s27 = smov 64   ;;  %s2892_s28 = smov 4  }
  0x5c   :  { %114 = dma.hbm_to_vmem [thread:$0]  %s3047_s9, 4096, %s109_s18, [#allocation14], %s2891_s27, %s2891_s27, %s2892_s28  }
  0x5d   :  { %2867 = dma.done.wait [#allocation3], 32  }
  0x5e   :  { %2868 = vsyncadd [#allocation3], 4294967264 }
  0x5f   :  { %2869 = dma.done.wait [#allocation5], 1360  }
  0x60   :  { %2870 = vsyncadd [#allocation5], 4294965936 }
  0x61   :  { %2871 = dma.done.wait [#allocation8], 14336  }
  0x62   :  { %2872 = vsyncadd [#allocation8], 4294952960 }
  0x63   :  { %2873 = dma.done.wait [#allocation11], 8224  }
  0x64   :  { %2874 = vsyncadd [#allocation11], 4294959072 }
  0x65   :  { %2875 = dma.done.wait [#allocation14], 4096  }
  0x66   :  { %2876 = vsyncadd [#allocation14], 4294963200  ;;  %v2893_v0 = vmov 0   ;;  %v2397_v1 = vld [vmem:[#allocation4 + $0x2c] ss:$20 sps:$4 sm:$0xff]   ;;  %vm235_vm0 = vcmask 261120  }
  0x67   :  { %271 = vmatprep.mubr.bf16.mxu0 %v2893_v0  ;;  %v2399_v2 = vld [vmem:[#allocation4 + $0x28] ss:$20 sps:$4 sm:$0xff]   ;;  %251 = vmatprep.subr.bf16.mxu0 %v2397_v1  ;;  %v2400_v3 = vld [vmem:[#allocation4 + $0x4] ss:$20 sps:$4 sm:$0xff]   ;;  %v2402_v4 = vld [vmem:[#allocation4] ss:$20 sps:$4 sm:$0xff]  }
  0x68   :  { %252 = vmatpush1.bf16.msra.mxu0 %v2399_v2  ;;  %v142_v5 = vld [vmem:[#allocation2] sm:$0x3]  ;;  %v2405_v6 = vld [vmem:[#allocation4 + $0x34] ss:$20 sps:$4 sm:$0xff]   ;;  %v2403_v8 = vld [vmem:[#allocation4 + $0x30] ss:$20 sps:$4 sm:$0xff]  }
  0x69   :  { %253 = vmatprep.subr.bf16.mxu0 %v2400_v3  ;;  %v143_v7 = vpack.c.bf16 %v142_v5, %v142_v5  ;;  %v2408_v9 = vld [vmem:[#allocation4 + $0xc] ss:$20 sps:$4 sm:$0xff]   ;;  %v2406_v13 = vld [vmem:[#allocation4 + $0x8] ss:$20 sps:$4 sm:$0xff]   ;;  %v2894_v17 = vmov 0.0   ;;  %vm2895_vm1 = vmmov 0  }
  0x6a   :  { %v2411_v10 = vld [vmem:[#allocation7 + $0x74] ss:$8 sps:$4 sm:$0xff]   ;;  %v2413_v11 = vld [vmem:[#allocation7 + $0x70] ss:$8 sps:$4 sm:$0xff]   ;;  %v2414_v12 = vld [vmem:[#allocation7 + $0x64] ss:$8 sps:$4 sm:$0xff]  }
  0x6b   :  { %868 = vmatprep.subr.bf16.mxu1 %v2411_v10  ;;  %v2416_v14 = vld [vmem:[#allocation7 + $0x60] ss:$8 sps:$4 sm:$0xff]   ;;  %v2417_v15 = vld [vmem:[#allocation7 + $0x54] ss:$8 sps:$4 sm:$0xff]   ;;  %v2419_v18 = vld [vmem:[#allocation7 + $0x50] ss:$8 sps:$4 sm:$0xff]  }
  0x6c   :  { %254 = vmatpush1.bf16.msra.mxu0 %v2402_v4  ;;  %869 = vmatpush1.bf16.msra.mxu1 %v2413_v11  ;;  %v2409_v16 = vld [vmem:[#allocation4 + $0x38] ss:$20 sps:$4 sm:$0xff]   ;;  %v2410_v20 = vld [vmem:[#allocation4 + $0x10] ss:$20 sps:$4 sm:$0xff]  }
  0x6d   :  { %292 = vmatprep.subr.bf16.mxu0 %v2405_v6  ;;  %870 = vmatprep.subr.bf16.mxu1 %v2414_v12  ;;  %v2423_v19 = vld [vmem:[#allocation7 + $0x44] ss:$8 sps:$4 sm:$0xff]   ;;  %v2422_v21 = vld [vmem:[#allocation7 + $0x174] ss:$8 sps:$4 sm:$0xff]   ;;  %v2425_v22 = vld [vmem:[#allocation7 + $0x40] ss:$8 sps:$4 sm:$0xff]  }
  0x6e   :  { %v2429_v23 = vld [vmem:[#allocation7 + $0x34] ss:$8 sps:$4 sm:$0xff]   ;;  %v2420_v24 = vld [vmem:[#allocation7 + $0x170] ss:$8 sps:$4 sm:$0xff]   ;;  %v2428_v25 = vld [vmem:[#allocation7 + $0x164] ss:$8 sps:$4 sm:$0xff]  }
  0x6f   :  { %2111 = vmatmul.mubr.msk.bf16.vlgmr.msra.gmra.mxu0 %vm235_vm0, %v143_v7  ;;  %v2431_v26 = vld [vmem:[#allocation7 + $0x30] ss:$8 sps:$4 sm:$0xff]   ;;  %v2435_v27 = vld [vmem:[#allocation7 + $0x24] ss:$8 sps:$4 sm:$0xff]   ;;  %v2426_v28 = vld [vmem:[#allocation7 + $0x160] ss:$8 sps:$4 sm:$0xff]  }
  0x70   :  { %293 = vmatpush1.bf16.msra.mxu0 %v2403_v8  ;;  %312 = vmatprep.mubr.bf16.mxu0 %v2893_v0  ;;  %v2434_v29 = vld [vmem:[#allocation7 + $0x154] ss:$8 sps:$4 sm:$0xff]   ;;  %v2437_v30 = vld [vmem:[#allocation7 + $0x20] ss:$8 sps:$4 sm:$0xff]   ;;  %v2432_v32 = vld [vmem:[#allocation7 + $0x150] ss:$8 sps:$4 sm:$0xff]  }
  0x71   :  { %294 = vmatprep.subr.bf16.mxu0 %v2408_v9  ;;  %871 = vmatpush1.bf16.msra.mxu1 %v2416_v14  ;;  %v2441_v31 = vld [vmem:[#allocation7 + $0x14] ss:$8 sps:$4 sm:$0xff]   ;;  %v2440_v33 = vld [vmem:[#allocation7 + $0x144] ss:$8 sps:$4 sm:$0xff]   ;;  %v2443_v34 = vld [vmem:[#allocation7 + $0x10] ss:$8 sps:$4 sm:$0xff]  }
  0x72   :  { %872 = vmatprep.subr.bf16.mxu1 %v2417_v15  ;;  %v2447_v35 = vld [vmem:[#allocation7 + $0x4] ss:$8 sps:$4 sm:$0xff]   ;;  %v2438_v36 = vld [vmem:[#allocation7 + $0x140] ss:$8 sps:$4 sm:$0xff]   ;;  %v2446_v37 = vld [vmem:[#allocation7 + $0x134] ss:$8 sps:$4 sm:$0xff]  }
  0x73   :  { %v2449_v38 = vld [vmem:[#allocation7] ss:$8 sps:$4 sm:$0xff]   ;;  %v2453_v39 = vld [vmem:[#allocation7 + $0xf4] ss:$8 sps:$4 sm:$0xff]   ;;  %v2444_v40 = vld [vmem:[#allocation7 + $0x130] ss:$8 sps:$4 sm:$0xff]  }
  0x74   :  { %295 = vmatpush1.bf16.msra.mxu0 %v2406_v13  ;;  %v2452_v41 = vld [vmem:[#allocation7 + $0x124] ss:$8 sps:$4 sm:$0xff]   ;;  %v2455_v42 = vld [vmem:[#allocation7 + $0xf0] ss:$8 sps:$4 sm:$0xff]   ;;  %v2450_v44 = vld [vmem:[#allocation7 + $0x120] ss:$8 sps:$4 sm:$0xff]  }
  0x75   :  { %2370 = vmatprep.subr.bf16.mxu0 %v2894_v17  ;;  %873 = vmatpush1.bf16.msra.mxu1 %v2419_v18  ;;  %v2459_v43 = vld [vmem:[#allocation7 + $0xe4] ss:$8 sps:$4 sm:$0xff]   ;;  %v2458_v45 = vld [vmem:[#allocation7 + $0x114] ss:$8 sps:$4 sm:$0xff]   ;;  %v2461_v46 = vld [vmem:[#allocation7 + $0xe0] ss:$8 sps:$4 sm:$0xff]  }
  0x76   :  { %874 = vmatprep.subr.bf16.mxu1 %v2423_v19  ;;  %v2465_v47 = vld [vmem:[#allocation7 + $0xd4] ss:$8 sps:$4 sm:$0xff]   ;;  %v2456_v48 = vld [vmem:[#allocation7 + $0x110] ss:$8 sps:$4 sm:$0xff]   ;;  %v2464_v49 = vld [vmem:[#allocation7 + $0x104] ss:$8 sps:$4 sm:$0xff]  }
  0x77   :  { %2112 = vmatmul.mubr.msk.bf16.vlgmr.msra.gmra.mxu0 %vm235_vm0, %v143_v7  ;;  %v2467_v50 = vld [vmem:[#allocation7 + $0xd0] ss:$8 sps:$4 sm:$0xff]   ;;  %v2471_v51 = vld [vmem:[#allocation7 + $0xc4] ss:$8 sps:$4 sm:$0xff]   ;;  %v2462_v52 = vld [vmem:[#allocation7 + $0x100] ss:$8 sps:$4 sm:$0xff]  }
  0x78   :  { %2371 = vmatpush3.bf16.msra.mxu0 %v2409_v16  ;;  %2374 = vmatprep.mubr.msk.bf16.mxu0 %vm2895_vm1, %v2894_v17  ;;  %v2470_v53 = vld [vmem:[#allocation7 + $0x1f4] ss:$8 sps:$4 sm:$0xff]   ;;  %v2473_v54 = vld [vmem:[#allocation7 + $0xc0] ss:$8 sps:$4 sm:$0xff]   ;;  %v2468_v56 = vld [vmem:[#allocation7 + $0x1f0] ss:$8 sps:$4 sm:$0xff]  }
  0x79   :  { %2372 = vmatprep.subr.bf16.mxu0 %v2894_v17  ;;  %875 = vmatpush1.bf16.msra.mxu1 %v2425_v22  ;;  %v2477_v55 = vld [vmem:[#allocation7 + $0xb4] ss:$8 sps:$4 sm:$0xff]   ;;  %v2476_v57 = vld [vmem:[#allocation7 + $0x1e4] ss:$8 sps:$4 sm:$0xff]   ;;  %v2479_v58 = vld [vmem:[#allocation7 + $0xb0] ss:$8 sps:$4 sm:$0xff]   ;;  %v158_v17 = vlaneseq }
  0x7a   :  { %876 = vmatprep.subr.bf16.mxu1 %v2429_v23  ;;  %v2483_v59 = vld [vmem:[#allocation7 + $0xa4] ss:$8 sps:$4 sm:$0xff]   ;;  %v2474_v60 = vld [vmem:[#allocation7 + $0x1e0] ss:$8 sps:$4 sm:$0xff]   ;;  %v2482_v61 = vld [vmem:[#allocation7 + $0x1d4] ss:$8 sps:$4 sm:$0xff]  }
  0x7b   :  { %v2480_v62 = vld [vmem:[#allocation7 + $0x1d0] ss:$8 sps:$4 sm:$0xff]   ;;  %v2485_v63 = vld [vmem:[#allocation7 + $0xa0] ss:$8 sps:$4 sm:$0xff]   ;;  %v2488_v1 = vld [vmem:[#allocation7 + $0x1c4] ss:$8 sps:$4 sm:$0xff]  }
  0x7c   :  { %2373 = vmatpush3.bf16.msra.mxu0 %v2410_v20  ;;  %v2486_v2 = vld [vmem:[#allocation7 + $0x1c0] ss:$8 sps:$4 sm:$0xff]   ;;  %v2489_v3 = vld [vmem:[#allocation7 + $0x94] ss:$8 sps:$4 sm:$0xff]   ;;  %v2491_v4 = vld [vmem:[#allocation7 + $0x90] ss:$8 sps:$4 sm:$0xff]  }
  0x7d   :  { %909 = vmatprep.subr.bf16.mxu0 %v2422_v21  ;;  %877 = vmatpush1.bf16.msra.mxu1 %v2431_v26  ;;  %v2494_v5 = vld [vmem:[#allocation7 + $0x1b4] ss:$8 sps:$4 sm:$0xff]   ;;  %v2492_v6 = vld [vmem:[#allocation7 + $0x1b0] ss:$8 sps:$4 sm:$0xff]   ;;  %v2497_v8 = vld [vmem:[#allocation7 + $0x80] ss:$8 sps:$4 sm:$0xff]  }
  0x7e   :  { %878 = vmatprep.subr.bf16.mxu1 %v2435_v27  ;;  %v2500_v9 = vld [vmem:[#allocation7 + $0x1a4] ss:$8 sps:$4 sm:$0xff]   ;;  %v2498_v10 = vld [vmem:[#allocation7 + $0x1a0] ss:$8 sps:$4 sm:$0xff]   ;;  %v2503_v11 = vld [vmem:[#allocation7 + $0x274] ss:$8 sps:$4 sm:$0xff]  }
  0x7f   :  { %2375 = vmatmul.mubr.msk.bf16.vlgmr.msra.gmra.mxu0 %vm235_vm0, %v143_v7  ;;  %v2495_v7 = vld [vmem:[#allocation7 + $0x84] ss:$8 sps:$4 sm:$0xff]   ;;  %v2506_v12 = vld [vmem:[#allocation7 + $0x194] ss:$8 sps:$4 sm:$0xff]   ;;  %v2504_v13 = vld [vmem:[#allocation7 + $0x190] ss:$8 sps:$4 sm:$0xff]  }
  0x80   :  { %910 = vmatpush1.bf16.msra.mxu0 %v2420_v24  ;;  %v2512_v14 = vld [vmem:[#allocation7 + $0x184] ss:$8 sps:$4 sm:$0xff]   ;;  %v2510_v15 = vld [vmem:[#allocation7 + $0x180] ss:$8 sps:$4 sm:$0xff]   ;;  %v2533_v16 = vld [vmem:[#allocation9 + $0x74] ss:$8 sps:$4 sm:$0xff]  }
  0x81   :  { %911 = vmatprep.subr.bf16.mxu0 %v2428_v25  ;;  %879 = vmatpush1.bf16.msra.mxu1 %v2437_v30  ;;  %v2991_v18 = vshrl.u32 %v158_v17, 7  ;;  %v2996_v20 = vld [vmem:[#allocation6] sm:$0x1f] }
  0x82   :  { %880 = vmatprep.subr.bf16.mxu1 %v2441_v31 }
  0x83   :  { %v2994_v19 = vsub.s32 0, %v2991_v18  ;;  %v2999_v21 = vsub.s32 1, %v2991_v18  ;;  %v168_v26 = vsub.s32 2, %v2991_v18  ;;  %v172_v30 = vsub.s32 3, %v2991_v18 }
  0x84   :  { %912 = vmatpush1.bf16.msra.mxu0 %v2426_v28 }
  0x85   :  { %913 = vmatprep.subr.bf16.mxu0 %v2434_v29  ;;  %881 = vmatpush1.bf16.msra.mxu1 %v2443_v34  ;;  %v161_v22 = vrot.slane %v2996_v20, %v2994_v19  ;;  %v165_v23 = vrot.slane %v2996_v20, %v2999_v21 }
  0x86   :  { %882 = vmatprep.subr.bf16.mxu1 %v2447_v35 }
  0x88   :  { %914 = vmatpush1.bf16.msra.mxu0 %v2432_v32  ;;  %v169_v32 = vrot.slane %v2996_v20, %v168_v26 }
  0x89   :  { %915 = vmatprep.subr.bf16.mxu0 %v2440_v33  ;;  %883 = vmatpush1.bf16.msra.mxu1 %v2449_v38 }
  0x8a   :  { %884 = vmatprep.subr.bf16.mxu1 %v2453_v39 }
  0x8c   :  { %916 = vmatpush1.bf16.msra.mxu0 %v2438_v36  ;;  %v173_v36 = vrot.slane %v2996_v20, %v172_v30 }
  0x8d   :  { %917 = vmatprep.subr.bf16.mxu0 %v2446_v37  ;;  %885 = vmatpush2.bf16.msra.mxu1 %v2455_v42 }
  0x8e   :  { %886 = vmatprep.subr.bf16.mxu1 %v2459_v43 }
  0x90   :  { %918 = vmatpush1.bf16.msra.mxu0 %v2444_v40 }
  0x91   :  { %919 = vmatprep.subr.bf16.mxu0 %v2452_v41  ;;  %887 = vmatpush2.bf16.msra.mxu1 %v2461_v46  ;;  %v2501_v41 = vld [vmem:[#allocation7 + $0x270] ss:$8 sps:$4 sm:$0xff]  }
  0x92   :  { %888 = vmatprep.subr.bf16.mxu1 %v2465_v47 }
  0x94   :  { %920 = vmatpush1.bf16.msra.mxu0 %v2450_v44  ;;  %v2509_v44 = vld [vmem:[#allocation7 + $0x264] ss:$8 sps:$4 sm:$0xff]  }
  0x95   :  { %921 = vmatprep.subr.bf16.mxu0 %v2458_v45  ;;  %889 = vmatpush2.bf16.msra.mxu1 %v2467_v50  ;;  %v2507_v50 = vld [vmem:[#allocation7 + $0x260] ss:$8 sps:$4 sm:$0xff]  }
  0x96   :  { %890 = vmatprep.subr.bf16.mxu1 %v2471_v51  ;;  %v2515_v51 = vld [vmem:[#allocation7 + $0x254] ss:$8 sps:$4 sm:$0xff]  }
  0x98   :  { %922 = vmatpush1.bf16.msra.mxu0 %v2456_v48 }
  0x99   :  { %923 = vmatprep.subr.bf16.mxu0 %v2464_v49  ;;  %891 = vmatpush2.bf16.msra.mxu1 %v2473_v54 }
  0x9a   :  { %892 = vmatprep.subr.bf16.mxu1 %v2477_v55 }
  0x9c   :  { %924 = vmatpush1.bf16.msra.mxu0 %v2462_v52 }
  0x9d   :  { %925 = vmatprep.subr.bf16.mxu0 %v2470_v53  ;;  %893 = vmatpush2.bf16.msra.mxu1 %v2479_v58  ;;  %v2531_v58 = vld [vmem:[#allocation9 + $0x70] ss:$8 sps:$4 sm:$0xff]  }
  0x9e   :  { %894 = vmatprep.subr.bf16.mxu1 %v2483_v59  ;;  %v2518_v59 = vld [vmem:[#allocation7 + $0x244] ss:$8 sps:$4 sm:$0xff]  }
  0xa0   :  { %926 = vmatpush2.bf16.msra.mxu0 %v2468_v56 }
  0xa1   :  { %927 = vmatprep.subr.bf16.mxu0 %v2476_v57  ;;  %895 = vmatpush2.bf16.msra.mxu1 %v2485_v63  ;;  %v2513_v57 = vld [vmem:[#allocation7 + $0x250] ss:$8 sps:$4 sm:$0xff]   ;;  %v2516_v63 = vld [vmem:[#allocation7 + $0x240] ss:$8 sps:$4 sm:$0xff]  }
  0xa2   :  { %896 = vmatprep.subr.bf16.mxu1 %v2489_v3 }
  0xa4   :  { %928 = vmatpush2.bf16.msra.mxu0 %v2474_v60 }
  0xa5   :  { %929 = vmatprep.subr.bf16.mxu0 %v2482_v61  ;;  %897 = vmatpush2.bf16.msra.mxu1 %v2491_v4  ;;  %v2536_v61 = vld [vmem:[#allocation9 + $0x64] ss:$8 sps:$4 sm:$0xff]   ;;  %v2539_v4 = vld [vmem:[#allocation9 + $0x54] ss:$8 sps:$4 sm:$0xff]  }
  0xa6   :  { %898 = vmatprep.subr.bf16.mxu1 %v2495_v7 }
  0xa8   :  { %930 = vmatpush2.bf16.msra.mxu0 %v2480_v62 }
  0xa9   :  { %931 = vmatprep.subr.bf16.mxu0 %v2488_v1  ;;  %899 = vmatpush2.bf16.msra.mxu1 %v2497_v8  ;;  %v2521_v1 = vld [vmem:[#allocation7 + $0x234] ss:$8 sps:$4 sm:$0xff]   ;;  %v2524_v8 = vld [vmem:[#allocation7 + $0x224] ss:$8 sps:$4 sm:$0xff]  }
  0xaa   :  { %950 = vmatprep.subr.bf16.mxu1 %v2503_v11  ;;  %v2540_v11 = vld [vmem:[#allocation9 + $0x40] ss:$8 sps:$4 sm:$0xff]  }
  0xac   :  { %932 = vmatpush2.bf16.msra.mxu0 %v2486_v2  ;;  %v176_v2 = vsub.s32 4, %v2991_v18 }
  0xad   :  { %933 = vmatprep.subr.bf16.mxu0 %v2494_v5  ;;  %v2519_v5 = vld [vmem:[#allocation7 + $0x230] ss:$8 sps:$4 sm:$0xff]  }
  0xae   :  { %v177_v7 = vrot.slane %v2996_v20, %v176_v2  ;;  %v2548_v20 = vld [vmem:[#allocation9 + $0x24] ss:$8 sps:$4 sm:$0xff]  }
  0xaf   :  { %v2629_v2 = vld [vmem:[#allocation12 + $0x1e4] ss:$16 sps:$4 sm:$0xff]  }
  0xb0   :  { %934 = vmatpush2.bf16.msra.mxu0 %v2492_v6  ;;  %v2537_v6 = vld [vmem:[#allocation9 + $0x50] ss:$8 sps:$4 sm:$0xff]  }
  0xb1   :  { %935 = vmatprep.subr.bf16.mxu0 %v2500_v9  ;;  %v2542_v9 = vld [vmem:[#allocation9 + $0x44] ss:$8 sps:$4 sm:$0xff]  }
  0xb4   :  { %936 = vmatpush2.bf16.msra.mxu0 %v2498_v10  ;;  %v2522_v10 = vld [vmem:[#allocation7 + $0x220] ss:$8 sps:$4 sm:$0xff]  }
  0xb5   :  { %937 = vmatprep.subr.bf16.mxu0 %v2506_v12 }
  0xb8   :  { %938 = vmatpush2.bf16.msra.mxu0 %v2504_v13  ;;  %v2527_v13 = vld [vmem:[#allocation7 + $0x214] ss:$8 sps:$4 sm:$0xff]  }
  0xb9   :  { %939 = vmatprep.subr.bf16.mxu0 %v2512_v14  ;;  %v2545_v14 = vld [vmem:[#allocation9 + $0x34] ss:$8 sps:$4 sm:$0xff]  }
  0xbc   :  { %940 = vmatpush2.bf16.msra.mxu0 %v2510_v15  ;;  %v2525_v15 = vld [vmem:[#allocation7 + $0x210] ss:$8 sps:$4 sm:$0xff]  }
  0xbd   :  { %1201 = vmatprep.subr.bf16.mxu0 %v2533_v16  ;;  %v2543_v16 = vld [vmem:[#allocation9 + $0x30] ss:$8 sps:$4 sm:$0xff]  }
 0x12f   :  { %v273_v24 = vpop.f32.mrf.mxu0 }
 0x130   :  { %v274_v25 = vadd.f32 %v273_v24, %v161_v22  ;;  %v2530_v22 = vld [vmem:[#allocation7 + $0x204] ss:$8 sps:$4 sm:$0xff]   ;;  %v2546_v24 = vld [vmem:[#allocation9 + $0x20] ss:$8 sps:$4 sm:$0xff]  }
 0x131   :  { %v275_v27 = vpop.f32.mrf.mxu0 }
 0x132   :  { %v361_v28 = vmul.f32 0.01, %v274_v25  ;;  %v276_v29 = vadd.f32 %v275_v27, %v165_v23  ;;  %v2528_v23 = vld [vmem:[#allocation7 + $0x200] ss:$8 sps:$4 sm:$0xff]  }
 0x133   :  { %v277_v31 = vpop.f32.mrf.mxu0 }
 0x134   :  { %v362_v33 = vmul.f32 0.01, %v276_v29  ;;  %v366_v34 = vmax.f32 %v274_v25, %v361_v28  ;;  %v2551_v28 = vld [vmem:[#allocation9 + $0x14] ss:$8 sps:$4 sm:$0xff]   ;;  %v2552_v31 = vld [vmem:[#allocation9] ss:$8 sps:$4 sm:$0xff]  }
 0x135   :  { %v278_v35 = vpop.f32.mrf.mxu0 }
 0x136   :  { %v367_v37 = vmax.f32 %v276_v29, %v362_v33  ;;  %v371_v42 = vpack.c.bf16 %v366_v34, %v366_v34  ;;  %v2549_v29 = vld [vmem:[#allocation9 + $0x10] ss:$8 sps:$4 sm:$0xff]   ;;  %v2557_v33 = vld [vmem:[#allocation9 + $0xf4] ss:$8 sps:$4 sm:$0xff]   ;;  %v2560_v35 = vld [vmem:[#allocation9 + $0xe4] ss:$8 sps:$4 sm:$0xff]  }
 0x137   :  { %v314_v38 = vpop.f32.mrf.mxu0  ;;  %v2555_v34 = vld [vmem:[#allocation9 + $0xf0] ss:$8 sps:$4 sm:$0xff]  }
 0x138   :  { %v315_v39 = vadd.f32 %v314_v38, %v169_v32  ;;  %v372_v40 = vpack.c.bf16 %v367_v37, %v367_v37  ;;  %v2554_v32 = vld [vmem:[#allocation9 + $0x4] ss:$8 sps:$4 sm:$0xff]   ;;  %v2563_v37 = vld [vmem:[#allocation9 + $0xd4] ss:$8 sps:$4 sm:$0xff]   ;;  %v2561_v38 = vld [vmem:[#allocation9 + $0xd0] ss:$8 sps:$4 sm:$0xff]  }
 0x139   :  { %v316_v43 = vpop.f32.mrf.mxu0 }
 0x13a   :  { %v363_v45 = vmul.f32 0.01, %v315_v39  ;;  %v317_v46 = vadd.f32 %v316_v43, %v173_v36  ;;  %900 = vmatprep.mubr.bf16.mxu1 %v372_v40  ;;  %v2558_v36 = vld [vmem:[#allocation9 + $0xe0] ss:$8 sps:$4 sm:$0xff]   ;;  %v2572_v43 = vld [vmem:[#allocation9 + $0xa4] ss:$8 sps:$4 sm:$0xff]  }
 0x13b   :  { %901 = vmatmul.mubr.bf16.vlgmr.msra.gmra.mxu1 %v371_v42  ;;  %v318_v47 = vpop.f32.mrf.mxu0  ;;  %v2564_v40 = vld [vmem:[#allocation9 + $0xc0] ss:$8 sps:$4 sm:$0xff]   ;;  %v2567_v42 = vld [vmem:[#allocation9 + $0xb0] ss:$8 sps:$4 sm:$0xff]  }
 0x13c   :  { %v368_v48 = vmax.f32 %v315_v39, %v363_v45  ;;  %v364_v49 = vmul.f32 0.01, %v317_v46  ;;  %951 = vmatpush1.bf16.msra.mxu1 %v2501_v41  ;;  %982 = vmatprep.mubr.bf16.mxu1 %v2893_v0  ;;  %v2534_v0 = vld [vmem:[#allocation9 + $0x60] ss:$8 sps:$4 sm:$0xff]   ;;  %v2566_v39 = vld [vmem:[#allocation9 + $0xc4] ss:$8 sps:$4 sm:$0xff]  }
 0x13d   :  { %952 = vmatprep.subr.bf16.mxu1 %v2509_v44  ;;  %v319_v52 = vpop.f32.mrf.mxu0  ;;  %v2569_v41 = vld [vmem:[#allocation9 + $0xb4] ss:$8 sps:$4 sm:$0xff]   ;;  %v2570_v44 = vld [vmem:[#allocation9 + $0xa0] ss:$8 sps:$4 sm:$0xff]   ;;  %v2578_v47 = vld [vmem:[#allocation9 + $0x84] ss:$8 sps:$4 sm:$0xff]  }
 0x13e   :  { %v369_v53 = vmax.f32 %v317_v46, %v364_v49  ;;  %v373_v54 = vpack.c.bf16 %v368_v48, %v368_v48  ;;  %v2575_v45 = vld [vmem:[#allocation9 + $0x94] ss:$8 sps:$4 sm:$0xff]   ;;  %v2573_v46 = vld [vmem:[#allocation9 + $0x90] ss:$8 sps:$4 sm:$0xff]   ;;  %v2576_v48 = vld [vmem:[#allocation9 + $0x80] ss:$8 sps:$4 sm:$0xff]  }
 0x13f   :  { %v355_v55 = vpop.f32.mrf.mxu0  ;;  %v2579_v49 = vld [vmem:[#allocation12 + $0xe0] ss:$16 sps:$4 sm:$0xff]   ;;  %v2587_v52 = vld [vmem:[#allocation12 + $0xc4] ss:$16 sps:$4 sm:$0xff]  }
 0x140   :  { %v374_v56 = vpack.c.bf16 %v369_v53, %v369_v53  ;;  %953 = vmatpush1.bf16.msra.mxu1 %v2507_v50  ;;  %v356_v12 = vadd.f32 %v355_v55, %v177_v7  ;;  %v2581_v50 = vld [vmem:[#allocation12 + $0xe4] ss:$16 sps:$4 sm:$0xff]   ;;  %v2585_v53 = vld [vmem:[#allocation12 + $0xc0] ss:$16 sps:$4 sm:$0xff]  }
 0x141   :  { %954 = vmatprep.subr.bf16.mxu1 %v2515_v51  ;;  %v2376_v60 = vpop.f32.mrf.mxu0  ;;  %v2584_v51 = vld [vmem:[#allocation12 + $0xec] ss:$16 sps:$4 sm:$0xff]   ;;  %v2591_v55 = vld [vmem:[#allocation12 + $0xa0] ss:$16 sps:$4 sm:$0xff]  }
 0x142   :  { %941 = vmatprep.mubr.bf16.mxu0 %v374_v56  ;;  %v365_v17 = vmul.f32 0.01, %v356_v12  ;;  %v2599_v56 = vld [vmem:[#allocation12 + $0x84] ss:$16 sps:$4 sm:$0xff]   ;;  %v2639_v7 = vld [vmem:[#allocation12 + $0x1a0] ss:$16 sps:$4 sm:$0xff]  }
 0x143   :  { %942 = vmatmul.mubr.bf16.vlgmr.msra.gmra.mxu0 %v373_v54  ;;  %v358_v62 = vpop.f32.mrf.mxu0  ;;  %v2593_v54 = vld [vmem:[#allocation12 + $0xa4] ss:$16 sps:$4 sm:$0xff]  }
 0x144   :  { %955 = vmatpush1.bf16.msra.mxu1 %v2513_v57  ;;  %1202 = vmatpush1.bf16.msra.mxu0 %v2531_v58  ;;  %v370_v25 = vmax.f32 %v356_v12, %v365_v17  ;;  %v2597_v57 = vld [vmem:[#allocation12 + $0x80] ss:$16 sps:$4 sm:$0xff]   ;;  %v2605_v58 = vld [vmem:[#allocation12 + $0x64] ss:$16 sps:$4 sm:$0xff]  }
 0x145   :  { %956 = vmatprep.subr.bf16.mxu1 %v2518_v59  ;;  %v2377_v3 = vpop.f32.mrf.mxu0  ;;  %1203 = vmatprep.subr.bf16.mxu0 %v2536_v61  ;;  %v2603_v59 = vld [vmem:[#allocation12 + $0x60] ss:$16 sps:$4 sm:$0xff]   ;;  %v2611_v60 = vld [vmem:[#allocation12 + $0x44] ss:$16 sps:$4 sm:$0xff]  }
 0x146   :  { %v375_v27 = vpack.c.bf16 %v370_v25, %v370_v25  ;;  %v2609_v61 = vld [vmem:[#allocation12 + $0x40] ss:$16 sps:$4 sm:$0xff]   ;;  %v2617_v62 = vld [vmem:[#allocation12 + $0x24] ss:$16 sps:$4 sm:$0xff]  }
 0x147   :  { %v2627_v3 = vld [vmem:[#allocation12 + $0x1e0] ss:$16 sps:$4 sm:$0xff]  }
 0x148   :  { %957 = vmatpush1.bf16.msra.mxu1 %v2516_v63  ;;  %1204 = vmatpush1.bf16.msra.mxu0 %v2534_v0  ;;  %v2615_v63 = vld [vmem:[#allocation12 + $0x20] ss:$16 sps:$4 sm:$0xff]   ;;  %v2623_v0 = vld [vmem:[#allocation12 + $0x4] ss:$16 sps:$4 sm:$0xff]  }
 0x149   :  { %958 = vmatprep.subr.bf16.mxu1 %v2521_v1  ;;  %1205 = vmatprep.subr.bf16.mxu0 %v2539_v4  ;;  %v2621_v1 = vld [vmem:[#allocation12] ss:$16 sps:$4 sm:$0xff]   ;;  %v2635_v4 = vld [vmem:[#allocation12 + $0x1c4] ss:$16 sps:$4 sm:$0xff]  }
 0x14c   :  { %959 = vmatpush1.bf16.msra.mxu1 %v2519_v5  ;;  %1206 = vmatpush1.bf16.msra.mxu0 %v2537_v6  ;;  %v2633_v5 = vld [vmem:[#allocation12 + $0x1c0] ss:$16 sps:$4 sm:$0xff]   ;;  %v2641_v6 = vld [vmem:[#allocation12 + $0x1a4] ss:$16 sps:$4 sm:$0xff]  }
 0x14d   :  { %960 = vmatprep.subr.bf16.mxu1 %v2524_v8  ;;  %1207 = vmatprep.subr.bf16.mxu0 %v2542_v9  ;;  %v2647_v8 = vld [vmem:[#allocation12 + $0x184] ss:$16 sps:$4 sm:$0xff]   ;;  %v2645_v9 = vld [vmem:[#allocation12 + $0x180] ss:$16 sps:$4 sm:$0xff]  }
 0x150   :  { %961 = vmatpush1.bf16.msra.mxu1 %v2522_v10  ;;  %1208 = vmatpush1.bf16.msra.mxu0 %v2540_v11  ;;  %v2653_v10 = vld [vmem:[#allocation12 + $0x164] ss:$16 sps:$4 sm:$0xff]   ;;  %v2651_v11 = vld [vmem:[#allocation12 + $0x160] ss:$16 sps:$4 sm:$0xff]  }
 0x151   :  { %962 = vmatprep.subr.bf16.mxu1 %v2527_v13  ;;  %1209 = vmatprep.subr.bf16.mxu0 %v2545_v14 }
 0x154   :  { %963 = vmatpush1.bf16.msra.mxu1 %v2525_v15  ;;  %1210 = vmatpush1.bf16.msra.mxu0 %v2543_v16 }
 0x155   :  { %964 = vmatprep.subr.bf16.mxu1 %v2530_v22  ;;  %1211 = vmatprep.subr.bf16.mxu0 %v2548_v20 }
 0x158   :  { %965 = vmatpush1.bf16.msra.mxu1 %v2528_v23  ;;  %1212 = vmatpush1.bf16.msra.mxu0 %v2546_v24  ;;  %v456_v23 = vld [vmem:[%s3042_s4] sm:$0x3] }
 0x159   :  { %1213 = vmatprep.subr.bf16.mxu0 %v2551_v28  ;;  %1654 = vmatprep.subr.bf16.mxu1 %v2581_v50  ;;  %v461_v24 = vrot.slane %v456_v23, %v2994_v19  ;;  %v465_v25 = vrot.slane %v456_v23, %v2999_v21  ;;  %v2600_v50 = vld [vmem:[#allocation12 + $0x88] ss:$16 sps:$4 sm:$0xff]  }
 0x15b   :  { %983 = vmatmul.mubr.bf16.vlgmr.msra.gmra.mxu1 %v375_v27 }
 0x15c   :  { %1214 = vmatpush1.bf16.msra.mxu0 %v2549_v29  ;;  %1655 = vmatpush1.bf16.msra.mxu1 %v2579_v49  ;;  %v2602_v49 = vld [vmem:[#allocation12 + $0x8c] ss:$16 sps:$4 sm:$0xff]  }
 0x15d   :  { %1215 = vmatprep.subr.bf16.mxu0 %v2554_v32  ;;  %1656 = vmatprep.subr.bf16.mxu1 %v2587_v52  ;;  %v2606_v52 = vld [vmem:[#allocation12 + $0x68] ss:$16 sps:$4 sm:$0xff]  }
 0x160   :  { %1216 = vmatpush1.bf16.msra.mxu0 %v2552_v31  ;;  %1657 = vmatpush1.bf16.msra.mxu1 %v2585_v53  ;;  %v2614_v53 = vld [vmem:[#allocation12 + $0x4c] ss:$16 sps:$4 sm:$0xff]  }
 0x161   :  { %1217 = vmatprep.subr.bf16.mxu0 %v2557_v33  ;;  %1658 = vmatprep.subr.bf16.mxu1 %v2593_v54  ;;  %v2612_v54 = vld [vmem:[#allocation12 + $0x48] ss:$16 sps:$4 sm:$0xff]  }
 0x164   :  { %1218 = vmatpush2.bf16.msra.mxu0 %v2555_v34  ;;  %1659 = vmatpush1.bf16.msra.mxu1 %v2591_v55  ;;  %v2620_v55 = vld [vmem:[#allocation12 + $0x2c] ss:$16 sps:$4 sm:$0xff]  }
 0x165   :  { %1219 = vmatprep.subr.bf16.mxu0 %v2560_v35  ;;  %1660 = vmatprep.subr.bf16.mxu1 %v2599_v56  ;;  %v2618_v56 = vld [vmem:[#allocation12 + $0x28] ss:$16 sps:$4 sm:$0xff]  }
 0x168   :  { %1220 = vmatpush2.bf16.msra.mxu0 %v2558_v36  ;;  %1661 = vmatpush1.bf16.msra.mxu1 %v2597_v57  ;;  %v2626_v57 = vld [vmem:[#allocation12 + $0xc] ss:$16 sps:$4 sm:$0xff]  }
 0x169   :  { %1221 = vmatprep.subr.bf16.mxu0 %v2563_v37  ;;  %1662 = vmatprep.subr.bf16.mxu1 %v2605_v58  ;;  %v2624_v58 = vld [vmem:[#allocation12 + $0x8] ss:$16 sps:$4 sm:$0xff]  }
 0x16c   :  { %1222 = vmatpush2.bf16.msra.mxu0 %v2561_v38  ;;  %1663 = vmatpush1.bf16.msra.mxu1 %v2603_v59  ;;  %v2632_v59 = vld [vmem:[#allocation12 + $0x1ec] ss:$16 sps:$4 sm:$0xff]  }
 0x16d   :  { %1223 = vmatprep.subr.bf16.mxu0 %v2566_v39  ;;  %1664 = vmatprep.subr.bf16.mxu1 %v2611_v60  ;;  %v2630_v60 = vld [vmem:[#allocation12 + $0x1e8] ss:$16 sps:$4 sm:$0xff]  }
 0x170   :  { %1224 = vmatpush2.bf16.msra.mxu0 %v2564_v40  ;;  %1665 = vmatpush1.bf16.msra.mxu1 %v2609_v61  ;;  %v2638_v61 = vld [vmem:[#allocation12 + $0x1cc] ss:$16 sps:$4 sm:$0xff]  }
 0x171   :  { %1225 = vmatprep.subr.bf16.mxu0 %v2569_v41  ;;  %1666 = vmatprep.subr.bf16.mxu1 %v2617_v62  ;;  %v2636_v62 = vld [vmem:[#allocation12 + $0x1c8] ss:$16 sps:$4 sm:$0xff]  }
 0x174   :  { %1226 = vmatpush2.bf16.msra.mxu0 %v2567_v42  ;;  %1667 = vmatpush1.bf16.msra.mxu1 %v2615_v63  ;;  %v2644_v63 = vld [vmem:[#allocation12 + $0x1ac] ss:$16 sps:$4 sm:$0xff]  }
 0x175   :  { %1227 = vmatprep.subr.bf16.mxu0 %v2572_v43  ;;  %1668 = vmatprep.subr.bf16.mxu1 %v2623_v0  ;;  %v2582_v43 = vld [vmem:[#allocation12 + $0xe8] ss:$16 sps:$4 sm:$0xff]  }
 0x176   :  { %v2642_v0 = vld [vmem:[#allocation12 + $0x1a8] ss:$16 sps:$4 sm:$0xff]  }
 0x178   :  { %1228 = vmatpush2.bf16.msra.mxu0 %v2570_v44  ;;  %1669 = vmatpush1.bf16.msra.mxu1 %v2621_v1  ;;  %v2650_v1 = vld [vmem:[#allocation12 + $0x18c] ss:$16 sps:$4 sm:$0xff]  }
 0x179   :  { %1229 = vmatprep.subr.bf16.mxu0 %v2575_v45  ;;  %1670 = vmatprep.subr.bf16.mxu1 %v2629_v2  ;;  %v2590_v45 = vld [vmem:[#allocation12 + $0xcc] ss:$16 sps:$4 sm:$0xff]   ;;  %v2648_v2 = vld [vmem:[#allocation12 + $0x188] ss:$16 sps:$4 sm:$0xff]  }
 0x17c   :  { %1230 = vmatpush2.bf16.msra.mxu0 %v2573_v46  ;;  %1671 = vmatpush2.bf16.msra.mxu1 %v2627_v3  ;;  %v2588_v46 = vld [vmem:[#allocation12 + $0xc8] ss:$16 sps:$4 sm:$0xff]   ;;  %v2656_v3 = vld [vmem:[#allocation12 + $0x16c] ss:$16 sps:$4 sm:$0xff]  }
 0x17d   :  { %1231 = vmatprep.subr.bf16.mxu0 %v2578_v47  ;;  %1672 = vmatprep.subr.bf16.mxu1 %v2635_v4  ;;  %v2596_v47 = vld [vmem:[#allocation12 + $0xac] ss:$16 sps:$4 sm:$0xff]   ;;  %v2654_v4 = vld [vmem:[#allocation12 + $0x168] ss:$16 sps:$4 sm:$0xff]  }
 0x180   :  { %1232 = vmatpush2.bf16.msra.mxu0 %v2576_v48  ;;  %1673 = vmatpush2.bf16.msra.mxu1 %v2633_v5  ;;  %v2594_v48 = vld [vmem:[#allocation12 + $0xa8] ss:$16 sps:$4 sm:$0xff]   ;;  %v2659_v5 = vld [vmem:[#allocation12 + $0x144] ss:$16 sps:$4 sm:$0xff]  }
 0x181   :  { %1695 = vmatprep.subr.bf16.mxu0 %v2584_v51  ;;  %1674 = vmatprep.subr.bf16.mxu1 %v2641_v6  ;;  %v2608_v51 = vld [vmem:[#allocation12 + $0x6c] ss:$16 sps:$4 sm:$0xff]  }
 0x182   :  { %v2662_v6 = vld [vmem:[#allocation12 + $0x14c] ss:$16 sps:$4 sm:$0xff]  }
 0x184   :  { %1675 = vmatpush2.bf16.msra.mxu1 %v2639_v7  ;;  %v2657_v7 = vld [vmem:[#allocation12 + $0x140] ss:$16 sps:$4 sm:$0xff]  }
 0x185   :  { %1676 = vmatprep.subr.bf16.mxu1 %v2647_v8  ;;  %v2660_v8 = vld [vmem:[#allocation12 + $0x148] ss:$16 sps:$4 sm:$0xff]  }
 0x188   :  { %1677 = vmatpush2.bf16.msra.mxu1 %v2645_v9  ;;  %v2665_v9 = vld [vmem:[#allocation12 + $0x124] ss:$16 sps:$4 sm:$0xff]  }
 0x189   :  { %1678 = vmatprep.subr.bf16.mxu1 %v2653_v10  ;;  %v2668_v10 = vld [vmem:[#allocation12 + $0x12c] ss:$16 sps:$4 sm:$0xff]  }
 0x18c   :  { %1679 = vmatpush2.bf16.msra.mxu1 %v2651_v11  ;;  %v2663_v11 = vld [vmem:[#allocation12 + $0x120] ss:$16 sps:$4 sm:$0xff]  }
 0x18d   :  { %1680 = vmatprep.subr.bf16.mxu1 %v2659_v5 }
 0x190   :  { %1681 = vmatpush2.bf16.msra.mxu1 %v2657_v7 }
 0x191   :  { %1682 = vmatprep.subr.bf16.mxu1 %v2665_v9 }
 0x194   :  { %1683 = vmatpush2.bf16.msra.mxu1 %v2663_v11  ;;  %v2693_v11 = vld [vmem:[#allocation13 + $0xf0] sm:$0xff]  }
 0x1fb   :  { %v902_v12 = vpop.f32.mrf.mxu1 }
 0x1fc   :  { %v903_v27 = vadd.f32 %v902_v12, %v461_v24  ;;  %v2666_v12 = vld [vmem:[#allocation12 + $0x128] ss:$16 sps:$4 sm:$0xff]  }
 0x1fd   :  { %v904_v13 = vpop.f32.mrf.mxu1 }
 0x1fe   :  { %v905_v28 = vadd.f32 %v904_v13, %v465_v25  ;;  %v2671_v13 = vld [vmem:[#allocation12 + $0x104] ss:$16 sps:$4 sm:$0xff]  }
 0x1ff   :  { %v906_v14 = vpop.f32.mrf.mxu1  ;;  %1684 = vmatprep.subr.bf16.mxu1 %v2671_v13  ;;  %v2694_v13 = vld [vmem:[#allocation13 + $0xb0] sm:$0xff]  }
 0x200   :  { %v2674_v14 = vld [vmem:[#allocation12 + $0x10c] ss:$16 sps:$4 sm:$0xff]  }
 0x201   :  { %v907_v15 = vpop.f32.mrf.mxu1 }
 0x202   :  { %v2669_v15 = vld [vmem:[#allocation12 + $0x100] ss:$16 sps:$4 sm:$0xff]  }
 0x203   :  { %v943_v16 = vpop.f32.mrf.mxu0  ;;  %1685 = vmatpush2.bf16.msra.mxu1 %v2669_v15  ;;  %v2696_v15 = vld [vmem:[#allocation13 + $0xa8] sm:$0xff]  }
 0x204   :  { %v944_v29 = vadd.f32 %v943_v16, %v903_v27  ;;  %v2672_v16 = vld [vmem:[#allocation12 + $0x108] ss:$16 sps:$4 sm:$0xff]  }
 0x205   :  { %v945_v17 = vpop.f32.mrf.mxu0 }
 0x206   :  { %v946_v32 = vadd.f32 %v945_v17, %v905_v28  ;;  %v2675_v17 = vld [vmem:[#allocation13 + $0x78] sm:$0xff]  }
 0x207   :  { %v947_v22 = vpop.f32.mrf.mxu0  ;;  %2326 = vmatprep.subr.bf16.mxu1 %v2675_v17  ;;  %v2698_v17 = vld [vmem:[#allocation13 + $0xa0] sm:$0xff]  }
 0x208   :  { %v1029_v22 = vld [vmem:[#allocation10] sm:$0x3] }
 0x209   :  { %v948_v20 = vpop.f32.mrf.mxu0  ;;  %v1038_v23 = vrot.slane %v1029_v22, %v2999_v21 }
 0x20a   :  { %v1034_v20 = vrot.slane %v1029_v22, %v2994_v19  ;;  %v2699_v22 = vld [vmem:[#allocation13 + $0xd8] sm:$0xff]  }
 0x21b   :  { %v984_v31 = vpop.f32.mrf.mxu1 }
 0x21c   :  { %v985_v33 = vadd.f32 %v984_v31, %v944_v29 }
 0x21d   :  { %v986_v34 = vpop.f32.mrf.mxu1 }
 0x21e   :  { %v991_v35 = vmul.f32 0.01, %v985_v33  ;;  %v987_v36 = vadd.f32 %v986_v34, %v946_v32 }
 0x21f   :  { %v988_v37 = vpop.f32.mrf.mxu1 }
 0x220   :  { %v992_v38 = vmul.f32 0.01, %v987_v36  ;;  %v993_v39 = vmax.f32 %v985_v33, %v991_v35  ;;  %v2676_v37 = vld [vmem:[#allocation13 + $0x38] sm:$0xff]  }
 0x221   :  { %v989_v40 = vpop.f32.mrf.mxu1 }
 0x222   :  { %v994_v41 = vmax.f32 %v987_v36, %v992_v38  ;;  %v995_v44 = vpack.c.bf16 %v993_v39, %v993_v39  ;;  %v2677_v39 = vld [vmem:[#allocation13 + $0x70] sm:$0xff]  }
 0x223   :  { %v2678_v40 = vld [vmem:[#allocation13 + $0x30] sm:$0xff]  }
 0x224   :  { %v996_v42 = vpack.c.bf16 %v994_v41, %v994_v41  ;;  %v2679_v41 = vld [vmem:[#allocation13 + $0x68] sm:$0xff]  }
 0x226   :  { %1233 = vmatprep.mubr.bf16.mxu0 %v996_v42  ;;  %v2680_v42 = vld [vmem:[#allocation13 + $0x28] sm:$0xff]  }
 0x227   :  { %1234 = vmatmul.mubr.bf16.vlgmr.msra.gmra.mxu0 %v995_v44  ;;  %v2682_v44 = vld [vmem:[#allocation13 + $0x20] sm:$0xff]  }
 0x228   :  { %1696 = vmatpush1.bf16.msra.mxu0 %v2582_v43  ;;  %v2681_v43 = vld [vmem:[#allocation13 + $0x60] sm:$0xff]  }
 0x229   :  { %1697 = vmatprep.subr.bf16.mxu0 %v2590_v45  ;;  %v2683_v45 = vld [vmem:[#allocation13 + $0x58] sm:$0xff]  }
 0x22c   :  { %1698 = vmatpush1.bf16.msra.mxu0 %v2588_v46  ;;  %v2684_v46 = vld [vmem:[#allocation13 + $0x18] sm:$0xff]  }
 0x22d   :  { %1699 = vmatprep.subr.bf16.mxu0 %v2596_v47  ;;  %v2685_v47 = vld [vmem:[#allocation13 + $0x50] sm:$0xff]  }
 0x230   :  { %1700 = vmatpush1.bf16.msra.mxu0 %v2594_v48  ;;  %v2686_v48 = vld [vmem:[#allocation13 + $0x10] sm:$0xff]  }
 0x231   :  { %1701 = vmatprep.subr.bf16.mxu0 %v2602_v49  ;;  %v2687_v49 = vld [vmem:[#allocation13 + $0x48] sm:$0xff]  }
 0x234   :  { %1702 = vmatpush1.bf16.msra.mxu0 %v2600_v50  ;;  %v2688_v50 = vld [vmem:[#allocation13 + $0x8] sm:$0xff]  }
 0x235   :  { %1703 = vmatprep.subr.bf16.mxu0 %v2608_v51  ;;  %v2689_v51 = vld [vmem:[#allocation13 + $0x40] sm:$0xff]  }
 0x238   :  { %1704 = vmatpush1.bf16.msra.mxu0 %v2606_v52  ;;  %v2690_v52 = vld [vmem:[#allocation13] sm:$0xff]  }
 0x239   :  { %1705 = vmatprep.subr.bf16.mxu0 %v2614_v53  ;;  %v2691_v53 = vld [vmem:[#allocation13 + $0xf8] sm:$0xff]  }
 0x23c   :  { %1706 = vmatpush1.bf16.msra.mxu0 %v2612_v54  ;;  %v1312_v54 = vld [vmem:[%s3046_s8] sm:$0xf] }
 0x23d   :  { %1707 = vmatprep.subr.bf16.mxu0 %v2620_v55  ;;  %v1317_v55 = vrot.slane %v1312_v54, %v2994_v19 }
 0x240   :  { %1708 = vmatpush1.bf16.msra.mxu0 %v2618_v56  ;;  %v1321_v56 = vrot.slane %v1312_v54, %v2999_v21 }
 0x241   :  { %1709 = vmatprep.subr.bf16.mxu0 %v2626_v57  ;;  %v1329_v57 = vrot.slane %v1312_v54, %v172_v30 }
 0x244   :  { %1710 = vmatpush1.bf16.msra.mxu0 %v2624_v58 }
 0x245   :  { %1711 = vmatprep.subr.bf16.mxu0 %v2632_v59 }
 0x248   :  { %1712 = vmatpush2.bf16.msra.mxu0 %v2630_v60 }
 0x249   :  { %1713 = vmatprep.subr.bf16.mxu0 %v2638_v61 }
 0x24c   :  { %1714 = vmatpush2.bf16.msra.mxu0 %v2636_v62 }
 0x24d   :  { %1715 = vmatprep.subr.bf16.mxu0 %v2644_v63 }
 0x250   :  { %1716 = vmatpush2.bf16.msra.mxu0 %v2642_v0 }
 0x251   :  { %1717 = vmatprep.subr.bf16.mxu0 %v2650_v1 }
 0x254   :  { %1718 = vmatpush2.bf16.msra.mxu0 %v2648_v2 }
 0x255   :  { %1719 = vmatprep.subr.bf16.mxu0 %v2656_v3 }
 0x258   :  { %1720 = vmatpush2.bf16.msra.mxu0 %v2654_v4 }
 0x259   :  { %1721 = vmatprep.subr.bf16.mxu0 %v2662_v6 }
 0x25c   :  { %1722 = vmatpush2.bf16.msra.mxu0 %v2660_v8 }
 0x25d   :  { %1723 = vmatprep.subr.bf16.mxu0 %v2668_v10  ;;  %v2692_v10 = vld [vmem:[#allocation13 + $0xb8] sm:$0xff]  }
 0x260   :  { %1724 = vmatpush2.bf16.msra.mxu0 %v2666_v12 }
 0x261   :  { %1725 = vmatprep.subr.bf16.mxu0 %v2674_v14  ;;  %v2695_v14 = vld [vmem:[#allocation13 + $0xe8] sm:$0xff]  }
 0x264   :  { %1726 = vmatpush2.bf16.msra.mxu0 %v2672_v16  ;;  %v2697_v16 = vld [vmem:[#allocation13 + $0xe0] sm:$0xff]  }
 0x2e7   :  { %v1235_v24 = vpop.f32.mrf.mxu0 }
 0x2e8   :  { %v1236_v25 = vadd.f32 %v1235_v24, %v1034_v20  ;;  %v2700_v20 = vld [vmem:[#allocation13 + $0x98] sm:$0xff]   ;;  %v2701_v24 = vld [vmem:[#allocation13 + $0xd0] sm:$0xff]  }
 0x2e9   :  { %v1237_v27 = vpop.f32.mrf.mxu0 }
 0x2ea   :  { %v1242_v28 = vmul.f32 0.01, %v1236_v25  ;;  %v1238_v29 = vadd.f32 %v1237_v27, %v1038_v23  ;;  %v1325_v23 = vrot.slane %v1312_v54, %v168_v26 }
 0x2eb   :  { %v1239_v31 = vpop.f32.mrf.mxu0 }
 0x2ec   :  { %v1243_v32 = vmul.f32 0.01, %v1238_v29  ;;  %v1244_v33 = vmax.f32 %v1236_v25, %v1242_v28  ;;  %v2702_v25 = vld [vmem:[#allocation13 + $0x90] sm:$0xff]   ;;  %v2703_v28 = vld [vmem:[#allocation13 + $0xc8] sm:$0xff]  }
 0x2ed   :  { %v1240_v34 = vpop.f32.mrf.mxu0 }
 0x2ee   :  { %v1245_v35 = vmax.f32 %v1238_v29, %v1243_v32  ;;  %v1246_v38 = vpack.c.bf16 %v1244_v33, %v1244_v33  ;;  %v2704_v29 = vld [vmem:[#allocation13 + $0x88] sm:$0xff]   ;;  %v2705_v32 = vld [vmem:[#allocation13 + $0xc0] sm:$0xff]  }
 0x2ef   :  { %v2706_v33 = vld [vmem:[#allocation13 + $0x80] sm:$0xff]  }
 0x2f0   :  { %v1247_v36 = vpack.c.bf16 %v1245_v35, %v1245_v35 }
 0x2f2   :  { %1686 = vmatprep.mubr.bf16.mxu1 %v1247_v36  ;;  %1727 = vmatprep.mubr.bf16.mxu0 %v1247_v36 }
 0x2f3   :  { %1687 = vmatmul.mubr.bf16.vlgmr.msra.gmra.mxu1 %v1246_v38  ;;  %1728 = vmatmul.mubr.bf16.vlgmr.msra.gmra.mxu0 %v1246_v38 }
 0x2f4   :  { %2327 = vmatpush3.bf16.msra.mxu1 %v2676_v37 }
 0x2f5   :  { %2328 = vmatprep.subr.bf16.mxu1 %v2677_v39  ;;  %v2290_v39 = vld [vmem:[%s3048_s10] ss:$0 sm:$0xff] }
 0x2f8   :  { %2329 = vmatpush3.bf16.msra.mxu1 %v2678_v40 }
 0x2f9   :  { %2330 = vmatprep.subr.bf16.mxu1 %v2679_v41 }
 0x2fc   :  { %2331 = vmatpush3.bf16.msra.mxu1 %v2680_v42 }
 0x2fd   :  { %2332 = vmatprep.subr.bf16.mxu1 %v2681_v43 }
 0x300   :  { %2333 = vmatpush3.bf16.msra.mxu1 %v2682_v44 }
 0x301   :  { %2334 = vmatprep.subr.bf16.mxu1 %v2683_v45 }
 0x304   :  { %2335 = vmatpush3.bf16.msra.mxu1 %v2684_v46 }
 0x305   :  { %2336 = vmatprep.subr.bf16.mxu1 %v2685_v47 }
 0x308   :  { %2337 = vmatpush3.bf16.msra.mxu1 %v2686_v48 }
 0x309   :  { %2338 = vmatprep.subr.bf16.mxu1 %v2687_v49 }
 0x30c   :  { %2339 = vmatpush3.bf16.msra.mxu1 %v2688_v50 }
 0x30d   :  { %2340 = vmatprep.subr.bf16.mxu1 %v2689_v51 }
 0x310   :  { %2341 = vmatpush3.bf16.msra.mxu1 %v2690_v52 }
 0x311   :  { %2348 = vmatprep.subr.bf16.mxu1 %v2691_v53 }
 0x3b3   :  { %v1688_v58 = vpop.f32.mrf.mxu1  ;;  %v1729_v59 = vpop.f32.mrf.mxu0 }
 0x3b4   :  { %v1689_v60 = vadd.f32 %v1688_v58, %v1317_v55  ;;  %v1730_v27 = vadd.f32 %v1729_v59, %v1325_v23 }
 0x3b5   :  { %v1690_v61 = vpop.f32.mrf.mxu1  ;;  %v1731_v62 = vpop.f32.mrf.mxu0 }
 0x3b6   :  { %v1736_v63 = vmul.f32 0.01, %v1689_v60  ;;  %v1691_v0 = vadd.f32 %v1690_v61, %v1321_v56  ;;  %v1732_v1 = vadd.f32 %v1731_v62, %v1329_v57  ;;  %v1738_v31 = vmul.f32 0.01, %v1730_v27 }
 0x3b7   :  { %v1692_v2 = vpop.f32.mrf.mxu1  ;;  %v1733_v3 = vpop.f32.mrf.mxu0 }
 0x3b8   :  { %v1737_v4 = vmul.f32 0.01, %v1691_v0  ;;  %v1739_v5 = vmul.f32 0.01, %v1732_v1  ;;  %v1740_v6 = vmax.f32 %v1689_v60, %v1736_v63  ;;  %v1742_v34 = vmax.f32 %v1730_v27, %v1738_v31 }
 0x3b9   :  { %v1693_v7 = vpop.f32.mrf.mxu1  ;;  %v1734_v19 = vpop.f32.mrf.mxu0 }
 0x3ba   :  { %v1741_v8 = vmax.f32 %v1691_v0, %v1737_v4  ;;  %v1743_v21 = vmax.f32 %v1732_v1, %v1739_v5  ;;  %v1744_v30 = vpack.c.bf16 %v1740_v6, %v1740_v6  ;;  %v1746_v35 = vpack.c.bf16 %v1742_v34, %v1742_v34 }
 0x3bc   :  { %v1745_v9 = vpack.c.bf16 %v1741_v8, %v1741_v8  ;;  %v1747_v12 = vpack.c.bf16 %v1743_v21, %v1743_v21 }
 0x3be   :  { %2043 = vmatprep.mubr.bf16.mxu1 %v1745_v9 }
 0x3bf   :  { %2044 = vmatmul.mubr.bf16.vlgmr.msra.gmra.mxu1 %v1744_v30 }
 0x3c0   :  { %2349 = vmatpush3.bf16.msra.mxu1 %v2692_v10  ;;  %2083 = vmatprep.mubr.bf16.mxu1 %v1747_v12 }
 0x3c1   :  { %2350 = vmatprep.subr.bf16.mxu1 %v2693_v11 }
 0x3c4   :  { %2351 = vmatpush3.bf16.msra.mxu1 %v2694_v13 }
 0x3c5   :  { %2352 = vmatprep.subr.bf16.mxu1 %v2695_v14 }
 0x3c8   :  { %2353 = vmatpush3.bf16.msra.mxu1 %v2696_v15 }
 0x3c9   :  { %2354 = vmatprep.subr.bf16.mxu1 %v2697_v16 }
 0x3cc   :  { %2355 = vmatpush3.bf16.msra.mxu1 %v2698_v17 }
 0x3cd   :  { %2356 = vmatprep.subr.bf16.mxu1 %v2699_v22 }
 0x3d0   :  { %2357 = vmatpush3.bf16.msra.mxu1 %v2700_v20 }
 0x3d1   :  { %2358 = vmatprep.subr.bf16.mxu1 %v2701_v24 }
 0x3d4   :  { %2359 = vmatpush3.bf16.msra.mxu1 %v2702_v25 }
 0x3d5   :  { %2360 = vmatprep.subr.bf16.mxu1 %v2703_v28 }
 0x3d8   :  { %2361 = vmatpush3.bf16.msra.mxu1 %v2704_v29 }
 0x3d9   :  { %2362 = vmatprep.subr.bf16.mxu1 %v2705_v32 }
 0x3dc   :  { %2363 = vmatpush3.bf16.msra.mxu1 %v2706_v33 }
 0x3df   :  { %2084 = vmatmul.mubr.bf16.vlgmr.msra.gmra.mxu1 %v1746_v35 }
 0x47f   :  { %v2342_v18 = vpop.f32.mrf.mxu1 }
 0x481   :  { %v2343_v26 = vpop.f32.mrf.mxu1 }
 0x482   :  { %v2344_v38 = vadd.f32 %v2343_v26, %v2342_v18 }
 0x483   :  { %v2345_v36 = vpop.f32.mrf.mxu1 }
 0x484   :  { %v2046_v42 = vadd.f32 %v2344_v38, %v2290_v39 }
 0x485   :  { %v2346_v37 = vpop.f32.mrf.mxu1 }
 0x49f   :  { %v2364_v40 = vpop.f32.mrf.mxu1 }
 0x4a1   :  { %v2365_v41 = vpop.f32.mrf.mxu1 }
 0x4a2   :  { %v2366_v43 = vadd.f32 %v2365_v41, %v2364_v40 }
 0x4a3   :  { %v2367_v44 = vpop.f32.mrf.mxu1 }
 0x4a4   :  { %v2086_v45 = vadd.f32 %v2366_v43, %v2046_v42 }
 0x4a5   :  { %v2368_v46 = vpop.f32.mrf.mxu1 }
 0x4a6   :  { %2091 = vst [vmem:[%s3049_s11] sm:$0x3] %v2086_v45 }
 0x4a7   :  { %2096 = vsyncpa [#allocation3], 1 }
 0x4a8   :  { %2097 = vsyncpa [#allocation5], 1 }
 0x4a9   :  { %2098 = vsyncpa [#allocation8], 1 }
 0x4aa   :  { %2099 = vsyncpa [#allocation11], 1 }
 0x4ab   :  { %2100 = vsyncpa [#allocation14], 1 }

</bundles_post_ra>
